<compile_context>
chip_gen: v5e
topology: v5e:2x2
jax: 0.10.0
libtpu: 0.0.40
codegen_flags: <defaults>
</compile_context>

<pallas_src>
import functools

import jax
import jax.numpy as jnp
from jax.experimental import pallas as pl
from jax.experimental.pallas import tpu as pltpu


def _round_up(n, m):
    return ((n + m - 1) // m) * m


def _vmem_cap_bytes():
    """Best-effort physical VMEM cap (leaves headroom); safe fallback for v7x."""
    try:
        cap = int(pltpu.get_tpu_info().vmem_capacity_bytes)
    except Exception:
        cap = 64 << 20  # v7x per-TC VMEM; conservative on v5e/v6e (128 MiB)
    return max(int(cap * 0.85), 32 << 20)


def _mlp_fused_kernel(x_ref, *refs, num_layers):
    """Fused MLP: refs = (w0, b0, ..., w_{L-1}, b_{L-1}, out_ref, a_ref)."""
    wb = refs[: 2 * num_layers]
    out_ref = refs[2 * num_layers]
    a_ref = refs[2 * num_layers + 1]

    h = x_ref[...]  # bf16 batch tile

    # Hidden layers: Linear + ReLU (batch_norm=False -> Identity). Activations
    # stay in vregs/VMEM for the whole chain; bf16 feeds the MXU, f32 accumulate.
    for li in range(num_layers - 1):
        w = wb[2 * li][...]                          # (d_in_p, d_out_p) bf16
        b = wb[2 * li + 1][...].astype(jnp.float32)  # (1, d_out_p), broadcasts
        y = jnp.dot(h, w, preferred_element_type=jnp.float32) + b
        y = jnp.maximum(y, 0.0)
        if li == num_layers - 2:
            # Last hidden activation (the module's `self.a`), stored in f32.
            a_ref[...] = y.astype(a_ref.dtype)
        h = y.astype(jnp.bfloat16)

    # Output layer (output_activation=None -> identity).
    w = wb[2 * (num_layers - 1)][...]
    b = wb[2 * (num_layers - 1) + 1][...].astype(jnp.float32)
    out = jnp.dot(h, w, preferred_element_type=jnp.float32) + b
    out_ref[...] = out.astype(out_ref.dtype)


def prepare_mlp_params(params, input_size, *, param_dtype=jnp.bfloat16):
    """Pad + cast the weight set ONCE (hoisted out of the per-call forward).

    params: list of (w: (d_in, d_out), b: (d_out,)) with len >= 2.
    Returns a dict consumed by mlp_forward.
    """
    assert len(params) >= 2, "need at least one hidden layer (for `a`)"
    dims_out = [w.shape[1] for (w, _) in params]
    dims_in = [input_size] + dims_out[:-1]
    dims_in_p = [_round_up(d, 128) for d in dims_in]
    dims_out_p = [_round_up(d, 128) for d in dims_out]

    # Zero-pad (exact: padded rows/cols contribute zero; padded bias is zero so
    # ReLU of padded lanes stays zero through the chain), cast to bf16 once.
    padded_wb = []
    for (w, b), dip, dop in zip(params, dims_in_p, dims_out_p):
        w_p = (jnp.zeros((dip, dop), param_dtype)
               .at[: w.shape[0], : w.shape[1]].set(w.astype(param_dtype)))
        b_p = (jnp.zeros((1, dop), param_dtype)
               .at[0, : b.shape[0]].set(b.astype(param_dtype)))
        padded_wb += [w_p, b_p]

    return {
        "padded_wb": tuple(padded_wb),
        "num_layers": len(params),
        "dims_in": dims_in,
        "dims_out": dims_out,
        "dims_in_p": dims_in_p,
        "dims_out_p": dims_out_p,
        "param_dtype": param_dtype,
    }


def mlp_forward(x, prepared, *, block_b=256, compute_dtype=jnp.bfloat16):
    """Returns (output, last_hidden_activation) exactly like MLP.forward.

    x: (B, Din) float; prepared: result of prepare_mlp_params.
    """
    B, Din = x.shape
    L = prepared["num_layers"]
    dims_out = prepared["dims_out"]
    dims_in_p = prepared["dims_in_p"]
    dims_out_p = prepared["dims_out_p"]
    padded_wb = prepared["padded_wb"]
    assert Din == prepared["dims_in"][0]

    # Batch tiling: sublane-aligned tiles; for medium batches, shrink the tile so
    # the parallel grid has >= 2 tiles (keeps both v7x TensorCores busy).
    b8 = _round_up(B, 8)
    if b8 > block_b:
        tb = block_b
    elif b8 >= 16:
        tb = _round_up((b8 + 1) // 2, 8)
    else:
        tb = b8
    b_pad = _round_up(b8, tb)
    grid = (b_pad // tb,)

    x_p = (jnp.zeros((b_pad, dims_in_p[0]), compute_dtype)
           .at[:B, :Din].set(x.astype(compute_dtype)))

    # Weights/biases: same block every grid step -> VMEM-resident; single-buffer
    # them (grid-invariant, so double-buffering buys nothing and wastes VMEM).
    in_specs = [pl.BlockSpec((tb, dims_in_p[0]), lambda i: (i, 0))]
    for dip, dop in zip(dims_in_p, dims_out_p):
        in_specs.append(
            pl.BlockSpec((dip, dop), lambda i: (0, 0), pipeline_mode=pl.Buffered(1)))
        in_specs.append(
            pl.BlockSpec((1, dop), lambda i: (0, 0), pipeline_mode=pl.Buffered(1)))

    dout_p = dims_out_p[-1]
    dhid_p = dims_out_p[-2]
    out_dtype = jnp.float32
    out_shapes = (
        jax.ShapeDtypeStruct((b_pad, dout_p), out_dtype),
        jax.ShapeDtypeStruct((b_pad, dhid_p), out_dtype),
    )
    out_specs = (
        pl.BlockSpec((tb, dout_p), lambda i: (i, 0)),
        pl.BlockSpec((tb, dhid_p), lambda i: (i, 0)),
    )

    # Explicit VMEM budget: resident bf16 weights/biases (single-buffered) +
    # double-buffered activation tiles + in-kernel f32 intermediates + headroom.
    isz = jnp.dtype(compute_dtype).itemsize
    weight_bytes = sum((dip * dop + dop) * isz
                       for dip, dop in zip(dims_in_p, dims_out_p))
    act_bytes = 2 * tb * dims_in_p[0] * isz                    # x tile, 2 bufs
    act_bytes += 2 * tb * (dout_p + dhid_p) * 4                # out/a tiles, 2 bufs
    act_bytes += 2 * tb * max(dims_out_p) * 4                  # f32 intermediates
    vmem_cap = _vmem_cap_bytes()
    vmem_limit = int(min(max(int((weight_bytes + act_bytes) * 1.5) + (8 << 20),
                             32 << 20),
                         vmem_cap))
    # TODO(synk): if weight_bytes exceeds ~half of VMEM (notably v7x's 64 MiB/TC),
    # fall back to tiling the largest layer's d_in/d_out with an inner
    # pltpu.emit_pipeline instead of keeping all weights resident.

    kern = functools.partial(_mlp_fused_kernel, num_layers=L)
    out_p, a_p = pl.pallas_call(
        kern,
        out_shape=out_shapes,
        grid=grid,
        in_specs=in_specs,
        out_specs=out_specs,
        compiler_params=pltpu.CompilerParams(
            dimension_semantics=("parallel",),
            vmem_limit_bytes=vmem_limit,
        ),
    )(x_p, *padded_wb)

    return out_p[:B, : dims_out[-1]], a_p[:B, : dims_out[-2]]


def init_mlp_params(key, input_size, output_size, hidden):
    """Deterministic synthetic init (shapes match nn.Linear layers, transposed)."""
    dims_in = [input_size] + hidden
    dims_out = hidden + [output_size]
    params = []
    for d_in, d_out in zip(dims_in, dims_out):
        key, kw, kb = jax.random.split(key, 3)
        bound = 1.0 / (d_in ** 0.5)
        w = jax.random.uniform(kw, (d_in, d_out), jnp.float32, -bound, bound)
        b = jax.random.uniform(kb, (d_out,), jnp.float32, -bound, bound)
        params.append((w, b))
    return params


def mlp_forward_ref(x, params):
    """Pure-JAX f32 reference for correctness check."""
    *hidden_params, (w_out, b_out) = params
    h = x
    a = None
    for (w, b) in hidden_params:
        h = jnp.maximum(h @ w + b, 0.0)
        a = h
    return h @ w_out + b_out, a


if __name__ == "__main__":
    key = jax.random.PRNGKey(0)
    kx, kp = jax.random.split(key)

    batch = 8
    input_size = 32
    hidden = [64, 48]
    output_size = 16

    x = jax.random.normal(kx, (batch, input_size), dtype=jnp.float32)
    params = init_mlp_params(kp, input_size, output_size, hidden)

    # Pad + bf16-cast the weights ONCE (not per forward call).
    prepared = prepare_mlp_params(params, input_size)

    out, a = mlp_forward(x, prepared)
    out = jax.block_until_ready(out)
    a = jax.block_until_ready(a)

    out_ref, a_ref = mlp_forward_ref(x, params)
    assert out.shape == (batch, output_size)
    assert a.shape == (batch, hidden[-1])
    # bf16 inputs/weights with f32 accumulation -> loosened tolerances.
    assert jnp.allclose(out, out_ref, atol=5e-2, rtol=5e-2)
    assert jnp.allclose(a, a_ref, atol=5e-2, rtol=5e-2)

    print("KERNEL_OK")
</pallas_src>

<mosaic_0001>
module attributes {stable_mosaic.version = 11 : i64} {
  func.func @_mlp_fused_kernel(%arg0: i32, %arg1: memref<8x128xbf16, #tpu.memory_space<vmem>>, %arg2: memref<128x128xbf16, #tpu.memory_space<vmem>>, %arg3: memref<1x128xbf16, #tpu.memory_space<vmem>>, %arg4: memref<128x128xbf16, #tpu.memory_space<vmem>>, %arg5: memref<1x128xbf16, #tpu.memory_space<vmem>>, %arg6: memref<128x128xbf16, #tpu.memory_space<vmem>>, %arg7: memref<1x128xbf16, #tpu.memory_space<vmem>>, %arg8: memref<8x128xf32, #tpu.memory_space<vmem>>, %arg9: memref<8x128xf32, #tpu.memory_space<vmem>>) attributes {dimension_semantics = [#tpu.dimension_semantics<parallel>], iteration_bounds = array<i64: 1>, scalar_prefetch = 0 : i64, scratch_operands = 0 : i64, tpu.core_type = #tpu.core_type<tc>, window_params = [{transform_indices = @transform_0, window_bounds = array<i64: 8, 128>}, {pipeline_mode = #tpu.pipeline_mode<synchronous>, transform_indices = @transform_1, window_bounds = array<i64: 128, 128>}, {pipeline_mode = #tpu.pipeline_mode<synchronous>, transform_indices = @transform_2, window_bounds = array<i64: 1, 128>}, {pipeline_mode = #tpu.pipeline_mode<synchronous>, transform_indices = @transform_3, window_bounds = array<i64: 128, 128>}, {pipeline_mode = #tpu.pipeline_mode<synchronous>, transform_indices = @transform_4, window_bounds = array<i64: 1, 128>}, {pipeline_mode = #tpu.pipeline_mode<synchronous>, transform_indices = @transform_5, window_bounds = array<i64: 128, 128>}, {pipeline_mode = #tpu.pipeline_mode<synchronous>, transform_indices = @transform_6, window_bounds = array<i64: 1, 128>}, {transform_indices = @transform_7, window_bounds = array<i64: 8, 128>}, {transform_indices = @transform_8, window_bounds = array<i64: 8, 128>}]} {
    %c0 = arith.constant 0 : index
    %c0_0 = arith.constant 0 : index
    %0 = vector.load %arg1[%c0, %c0_0] : memref<8x128xbf16, #tpu.memory_space<vmem>>, vector<8x128xbf16>
    %c0_1 = arith.constant 0 : index
    %c0_2 = arith.constant 0 : index
    %1 = vector.load %arg2[%c0_1, %c0_2] : memref<128x128xbf16, #tpu.memory_space<vmem>>, vector<128x128xbf16>
    %c0_3 = arith.constant 0 : index
    %c0_4 = arith.constant 0 : index
    %2 = vector.load %arg3[%c0_3, %c0_4] : memref<1x128xbf16, #tpu.memory_space<vmem>>, vector<1x128xbf16>
    %3 = arith.extf %2 : vector<1x128xbf16> to vector<1x128xf32>
    %cst = arith.constant dense<0.000000e+00> : vector<8x128xf32>
    %4 = tpu.matmul %0, %1, %cst {dimension_numbers = #tpu.dot_dimension_numbers<[1], [0], [0], [1], [0, 0, 1, 1], [], []>} : vector<8x128xbf16>, vector<128x128xbf16>, vector<8x128xf32> -> vector<8x128xf32>
    %5 = vector.broadcast %3 : vector<1x128xf32> to vector<8x128xf32>
    %6 = arith.addf %4, %5 : vector<8x128xf32>
    %cst_5 = arith.constant 0.000000e+00 : f32
    %7 = vector.broadcast %cst_5 : f32 to vector<8x128xf32>
    %8 = arith.maximumf %6, %7 : vector<8x128xf32>
    %9 = arith.truncf %8 : vector<8x128xf32> to vector<8x128xbf16>
    %c0_6 = arith.constant 0 : index
    %c0_7 = arith.constant 0 : index
    %10 = vector.load %arg4[%c0_6, %c0_7] : memref<128x128xbf16, #tpu.memory_space<vmem>>, vector<128x128xbf16>
    %c0_8 = arith.constant 0 : index
    %c0_9 = arith.constant 0 : index
    %11 = vector.load %arg5[%c0_8, %c0_9] : memref<1x128xbf16, #tpu.memory_space<vmem>>, vector<1x128xbf16>
    %12 = arith.extf %11 : vector<1x128xbf16> to vector<1x128xf32>
    %cst_10 = arith.constant dense<0.000000e+00> : vector<8x128xf32>
    %13 = tpu.matmul %9, %10, %cst_10 {dimension_numbers = #tpu.dot_dimension_numbers<[1], [0], [0], [1], [0, 0, 1, 1], [], []>} : vector<8x128xbf16>, vector<128x128xbf16>, vector<8x128xf32> -> vector<8x128xf32>
    %14 = vector.broadcast %12 : vector<1x128xf32> to vector<8x128xf32>
    %15 = arith.addf %13, %14 : vector<8x128xf32>
    %cst_11 = arith.constant 0.000000e+00 : f32
    %16 = vector.broadcast %cst_11 : f32 to vector<8x128xf32>
    %17 = arith.maximumf %15, %16 : vector<8x128xf32>
    %c0_12 = arith.constant 0 : index
    %c0_13 = arith.constant 0 : index
    %18 = vector.load %arg9[%c0_12, %c0_13] : memref<8x128xf32, #tpu.memory_space<vmem>>, vector<8x128xf32>
    tpu.vector_store %arg9[%c0_12, %c0_13], %17 {strides = array<i32>} : memref<8x128xf32, #tpu.memory_space<vmem>>, vector<8x128xf32>,
    %19 = arith.truncf %17 : vector<8x128xf32> to vector<8x128xbf16>
    %c0_14 = arith.constant 0 : index
    %c0_15 = arith.constant 0 : index
    %20 = vector.load %arg6[%c0_14, %c0_15] : memref<128x128xbf16, #tpu.memory_space<vmem>>, vector<128x128xbf16>
    %c0_16 = arith.constant 0 : index
    %c0_17 = arith.constant 0 : index
    %21 = vector.load %arg7[%c0_16, %c0_17] : memref<1x128xbf16, #tpu.memory_space<vmem>>, vector<1x128xbf16>
    %22 = arith.extf %21 : vector<1x128xbf16> to vector<1x128xf32>
    %cst_18 = arith.constant dense<0.000000e+00> : vector<8x128xf32>
    %23 = tpu.matmul %19, %20, %cst_18 {dimension_numbers = #tpu.dot_dimension_numbers<[1], [0], [0], [1], [0, 0, 1, 1], [], []>} : vector<8x128xbf16>, vector<128x128xbf16>, vector<8x128xf32> -> vector<8x128xf32>
    %24 = vector.broadcast %22 : vector<1x128xf32> to vector<8x128xf32>
    %25 = arith.addf %23, %24 : vector<8x128xf32>
    %c0_19 = arith.constant 0 : index
    %c0_20 = arith.constant 0 : index
    %26 = vector.load %arg8[%c0_19, %c0_20] : memref<8x128xf32, #tpu.memory_space<vmem>>, vector<8x128xf32>
    tpu.vector_store %arg8[%c0_19, %c0_20], %25 {strides = array<i32>} : memref<8x128xf32, #tpu.memory_space<vmem>>, vector<8x128xf32>,
    return
  }
  func.func @transform_0(%arg0: i32) -> (i32, i32) {
    %c0_i32 = arith.constant 0 : i32
    %c0_i32_0 = arith.constant 0 : i32
    return %arg0, %c0_i32 : i32, i32
  }
  func.func @transform_1(%arg0: i32) -> (i32, i32) {
    %c0_i32 = arith.constant 0 : i32
    %c0_i32_0 = arith.constant 0 : i32
    %c0_i32_1 = arith.constant 0 : i32
    return %c0_i32, %c0_i32_0 : i32, i32
  }
  func.func @transform_2(%arg0: i32) -> (i32, i32) {
    %c0_i32 = arith.constant 0 : i32
    %c0_i32_0 = arith.constant 0 : i32
    %c0_i32_1 = arith.constant 0 : i32
    return %c0_i32, %c0_i32_0 : i32, i32
  }
  func.func @transform_3(%arg0: i32) -> (i32, i32) {
    %c0_i32 = arith.constant 0 : i32
    %c0_i32_0 = arith.constant 0 : i32
    %c0_i32_1 = arith.constant 0 : i32
    return %c0_i32, %c0_i32_0 : i32, i32
  }
  func.func @transform_4(%arg0: i32) -> (i32, i32) {
    %c0_i32 = arith.constant 0 : i32
    %c0_i32_0 = arith.constant 0 : i32
    %c0_i32_1 = arith.constant 0 : i32
    return %c0_i32, %c0_i32_0 : i32, i32
  }
  func.func @transform_5(%arg0: i32) -> (i32, i32) {
    %c0_i32 = arith.constant 0 : i32
    %c0_i32_0 = arith.constant 0 : i32
    %c0_i32_1 = arith.constant 0 : i32
    return %c0_i32, %c0_i32_0 : i32, i32
  }
  func.func @transform_6(%arg0: i32) -> (i32, i32) {
    %c0_i32 = arith.constant 0 : i32
    %c0_i32_0 = arith.constant 0 : i32
    %c0_i32_1 = arith.constant 0 : i32
    return %c0_i32, %c0_i32_0 : i32, i32
  }
  func.func @transform_7(%arg0: i32) -> (i32, i32) {
    %c0_i32 = arith.constant 0 : i32
    %c0_i32_0 = arith.constant 0 : i32
    return %arg0, %c0_i32 : i32, i32
  }
  func.func @transform_8(%arg0: i32) -> (i32, i32) {
    %c0_i32 = arith.constant 0 : i32
    %c0_i32_0 = arith.constant 0 : i32
    return %arg0, %c0_i32 : i32, i32
  }
}

</mosaic_0001>

<bundles_post_ra>
// kernel: tpu_custom_call.1
= control target key start
LH: loop header
LB: loop body
LE: loop exit
PB: predicated region body
PF: predicated region fallthrough
CT: control target
= control target key end

     0   :  { %14 = vsyncpa [#allocation3], 0  ;;  %s735_s0 = inlined_call_operand.hbm [shape: bf16[8,128], index: 0, kind: input, shape index: {}]   ;;  %s736_s1 = inlined_call_operand.hbm [shape: bf16[128,128], index: 1, kind: input, shape index: {}]   ;;  %s737_s2 = inlined_call_operand.vmem [shape: bf16[1,128], index: 2, kind: input, shape index: {}]   ;;  %s738_s3 = inlined_call_operand.hbm [shape: bf16[128,128], index: 3, kind: input, shape index: {}]   ;;  %s739_s4 = inlined_call_operand.vmem [shape: bf16[1,128], index: 4, kind: input, shape index: {}]   ;;  %s740_s5 = inlined_call_operand.hbm [shape: bf16[128,128], index: 5, kind: input, shape index: {}]   ;;  %s741_s6 = inlined_call_operand.vmem [shape: bf16[1,128], index: 6, kind: input, shape index: {}]   ;;  %s742_s7 = inlined_call_operand.hbm [shape: f32[8,128], index: 7, kind: output, shape index: {0}]   ;;  %s743_s8 = inlined_call_operand.hbm [shape: f32[8,128], index: 8, kind: output, shape index: {1}]  }
   0x1   :  { %15 = vsyncpa [#allocation6], 0 }
   0x2   :  { %16 = vsyncpa [#allocation9], 0 }
   0x3   :  { %17 = vsyncpa [#allocation4], 0  ;;  %s34_s29 = sshll.u32 %s736_s1, 4  ;;  %s35_s29 = int_to_ptr.hbm [resolvable:$true] %s34_s29 }
   0x4   :  { %18 = vsyncpa [#allocation12], 0  ;;  %s655_s30 = smov [#allocation5]   ;;  %s24_s12 = sshll.u32 %s735_s0, 4  ;;  %s25_s12 = int_to_ptr.hbm [resolvable:$true] %s24_s12 }
   0x5   :  { %s36_s9 = sshll.u32 %s655_s30, 4  ;;  %s656_s13 = smov 64   ;;  %s37_s9 = int_to_ptr.vmem [resolvable:$true] %s36_s9 }
   0x6   :  { %s657_s14 = smov 4   ;;  %s658_s15 = smov [#allocation2]  }
   0x7   :  { %42 = dma.hbm_to_vmem [thread:$0]  %s35_s29, 1024, %s37_s9, [#allocation6], %s656_s13, %s656_s13, %s657_s14  }
   0x8   :  { %s26_s16 = sshll.u32 %s658_s15, 4  ;;  %s49_s19 = sshll.u32 %s738_s3, 4  ;;  %s27_s16 = int_to_ptr.vmem [resolvable:$true] %s26_s16  ;;  %s50_s19 = int_to_ptr.hbm [resolvable:$true] %s49_s19 }
   0x9   :  { %29 = dma.hbm_to_vmem [thread:$0]  %s25_s12, 64, %s27_s16, [#allocation3]  }
   0xa   :  { %s64_s21 = sshll.u32 %s740_s5, 4  ;;  %s659_s22 = smov [#allocation7]   ;;  %s65_s21 = int_to_ptr.hbm [resolvable:$true] %s64_s21 }
   0xb   :  { %s51_s23 = sshll.u32 %s659_s22, 4  ;;  %s660_s0 = smov [#allocation8]   ;;  %s52_s23 = int_to_ptr.vmem [resolvable:$true] %s51_s23 }
   0xc   :  { %57 = dma.hbm_to_vmem [thread:$0]  %s50_s19, 1024, %s52_s23, [#allocation6], %s656_s13, %s656_s13, %s657_s14  }
   0xd   :  { %s66_s24 = sshll.u32 %s660_s0, 4  ;;  %s67_s24 = int_to_ptr.vmem [resolvable:$true] %s66_s24 }
   0xe   :  { %72 = dma.hbm_to_vmem [thread:$0]  %s65_s21, 1024, %s67_s24, [#allocation9], %s656_s13, %s656_s13, %s657_s14  }
   0xf   :  { %645 = dma.done.wait [#allocation3], 64  }
  0x10   :  { %646 = vsyncadd [#allocation3], 4294967232 }
  0x11   :  { %647 = dma.done.wait [#allocation6], 2048  }
  0x12   :  { %648 = vsyncadd [#allocation6], 4294965248 }
  0x13   :  { %649 = dma.done.wait [#allocation9], 1024  }
  0x14   :  { %650 = vsyncadd [#allocation9], 4294966272  ;;  %v476_v0 = vld [vmem:[#allocation5 + $0x38] sm:$0xff]  ;;  %v475_v1 = vld [vmem:[#allocation5 + $0x30] sm:$0xff]  ;;  %s356_s30 = sshll.u32 %s743_s8, 4  ;;  %s662_s10 = smov [#allocation10]   ;;  %s357_s30 = int_to_ptr.hbm [resolvable:$true] %s356_s30 }
  0x15   :  { %159 = vmatpush.bf16.msra.mxu0 %v476_v0  ;;  %v484_v2 = vld [vmem:[#allocation7 + $0x38] sm:$0xff]  ;;  %v483_v3 = vld [vmem:[#allocation7 + $0x30] sm:$0xff]  ;;  %v474_v4 = vld [vmem:[#allocation5 + $0x28] sm:$0xff]  ;;  %s343_s11 = sshll.u32 %s662_s10, 4  ;;  %s345_s14 = sshll.u32 %s742_s7, 4  ;;  %s344_s11 = int_to_ptr.vmem [resolvable:$true] %s343_s11  ;;  %s346_s14 = int_to_ptr.hbm [resolvable:$true] %s345_s14 }
  0x16   :  { %241 = vmatpush.bf16.msra.mxu1 %v484_v2  ;;  %v482_v5 = vld [vmem:[#allocation7 + $0x28] sm:$0xff]  ;;  %v473_v6 = vld [vmem:[#allocation5 + $0x20] sm:$0xff]  ;;  %v472_v8 = vld [vmem:[#allocation5 + $0x18] sm:$0xff] }
  0x17   :  { %v481_v7 = vld [vmem:[#allocation7 + $0x20] sm:$0xff]  ;;  %v480_v9 = vld [vmem:[#allocation7 + $0x18] sm:$0xff]  ;;  %v471_v10 = vld [vmem:[#allocation5 + $0x10] sm:$0xff] }
  0x18   :  { %v479_v11 = vld [vmem:[#allocation7 + $0x10] sm:$0xff]  ;;  %v470_v12 = vld [vmem:[#allocation5 + $0x8] sm:$0xff]  ;;  %v469_v13 = vld [vmem:[#allocation5] sm:$0xff] }
  0x19   :  { %160 = vmatpush.bf16.msra.mxu0 %v475_v1  ;;  %v91_v14 = vld [vmem:[#allocation2] sm:$0xf]  ;;  %v478_v15 = vld [vmem:[#allocation7 + $0x8] sm:$0xff]  ;;  %v477_v16 = vld [vmem:[#allocation7] sm:$0xff] }
  0x1a   :  { %242 = vmatpush.bf16.msra.mxu1 %v483_v3  ;;  %v492_v17 = vld [vmem:[#allocation8 + $0x38] sm:$0xff]  ;;  %v491_v18 = vld [vmem:[#allocation8 + $0x30] sm:$0xff]  ;;  %v490_v19 = vld [vmem:[#allocation8 + $0x28] sm:$0xff] }
  0x1b   :  { %324 = vmatpush.bf16.msra.mxu2 %v492_v17  ;;  %v489_v20 = vld [vmem:[#allocation8 + $0x20] sm:$0xff]  ;;  %v108_v21 = vld [vmem:[%s737_s2] sm:$0x1]  ;;  %v487_v24 = vld [vmem:[#allocation8 + $0x10] sm:$0xff]  ;;  %s661_s2 = smov [#allocation11]  }
  0x1c   :  { %v488_v22 = vld [vmem:[#allocation8 + $0x18] sm:$0xff]  ;;  %v109_v23 = vunpack.c.l.bf16 %v108_v21  ;;  %v486_v31 = vld [vmem:[#allocation8 + $0x8] sm:$0xff]  ;;  %v485_v32 = vld [vmem:[#allocation8] sm:$0xff]  ;;  %s354_s27 = sshll.u32 %s661_s2, 4  ;;  %s355_s27 = int_to_ptr.vmem [resolvable:$true] %s354_s27 }
  0x1d   :  { %161 = vmatpush.bf16.msra.mxu0 %v474_v4  ;;  %v190_v33 = vld [vmem:[%s739_s4] sm:$0x1] }
  0x1e   :  { %243 = vmatpush.bf16.msra.mxu1 %v482_v5  ;;  %v110_v25 = vperm.slane %v109_v23, 0  ;;  %v191_v34 = vunpack.c.l.bf16 %v190_v33  ;;  %v273_v41 = vld [vmem:[%s741_s6] sm:$0x1] }
  0x1f   :  { %325 = vmatpush.bf16.msra.mxu2 %v491_v18  ;;  %v274_v42 = vunpack.c.l.bf16 %v273_v41 }
  0x20   :  { %v192_v35 = vperm.slane %v191_v34, 0 }
  0x21   :  { %162 = vmatpush.bf16.msra.mxu0 %v473_v6  ;;  %v275_v43 = vperm.slane %v274_v42, 0 }
  0x22   :  { %244 = vmatpush.bf16.msra.mxu1 %v481_v7 }
  0x23   :  { %326 = vmatpush.bf16.msra.mxu2 %v490_v19 }
  0x25   :  { %163 = vmatpush.bf16.msra.mxu0 %v472_v8 }
  0x26   :  { %245 = vmatpush.bf16.msra.mxu1 %v480_v9 }
  0x27   :  { %327 = vmatpush.bf16.msra.mxu2 %v489_v20 }
  0x29   :  { %164 = vmatpush.bf16.msra.mxu0 %v471_v10 }
  0x2a   :  { %246 = vmatpush.bf16.msra.mxu1 %v479_v11 }
  0x2b   :  { %328 = vmatpush.bf16.msra.mxu2 %v488_v22 }
  0x2d   :  { %165 = vmatpush.bf16.msra.mxu0 %v470_v12 }
  0x2e   :  { %247 = vmatpush.bf16.msra.mxu1 %v478_v15 }
  0x2f   :  { %329 = vmatpush.bf16.msra.mxu2 %v487_v24 }
  0x31   :  { %166 = vmatpush.bf16.msra.mxu0 %v469_v13 }
  0x32   :  { %248 = vmatpush.bf16.msra.mxu1 %v477_v16 }
  0x33   :  { %330 = vmatpush.bf16.msra.mxu2 %v486_v31 }
  0x34   :  { %167 = vmatmul.bf16.vlgmr.msra.gmra.mxu0 %v91_v14 }
  0x37   :  { %331 = vmatpush.bf16.msra.mxu2 %v485_v32 }
  0xb1   :  { %v168_v26 = vpop.f32.mrf.mxu0 }
  0xb2   :  { %v169_v27 = vadd.f32 %v168_v26, %v110_v25 }
  0xb4   :  { %v172_v28 = vmax.f32 %v169_v27, 0.0 }
  0xb6   :  { %v173_v29 = vpack.c.bf16 %v172_v28, %v172_v28 }
  0xb8   :  { %249 = vmatmul.bf16.vlgmr.msra.gmra.mxu1 %v173_v29 }
  0xb9   :  { %v170_v30 = vpop.f32.mrf.mxu0 }
 0x135   :  { %v250_v36 = vpop.f32.mrf.mxu1 }
 0x136   :  { %v251_v37 = vadd.f32 %v250_v36, %v192_v35 }
 0x138   :  { %v254_v38 = vmax.f32 %v251_v37, 0.0 }
 0x13a   :  { %255 = vst [vmem:[#allocation11] sm:$0xff] %v254_v38  ;;  %v256_v39 = vpack.c.bf16 %v254_v38, %v254_v38 }
 0x13b   :  { %359 = dma.vmem_to_hbm [thread:$0]  %s355_s27, 128, %s357_s30, [#allocation12]  }
 0x13c   :  { %332 = vmatmul.bf16.vlgmr.msra.gmra.mxu2 %v256_v39 }
 0x13d   :  { %v252_v40 = vpop.f32.mrf.mxu1 }
 0x1bf   :  { %v333_v44 = vpop.f32.mrf.mxu2 }
 0x1c0   :  { %v334_v45 = vadd.f32 %v333_v44, %v275_v43 }
 0x1c2   :  { %337 = vst [vmem:[#allocation10] sm:$0xff] %v334_v45 }
 0x1c3   :  { %348 = dma.vmem_to_hbm [thread:$0]  %s344_s11, 128, %s346_s14, [#allocation4]  }
 0x1c7   :  { %v335_v46 = vpop.f32.mrf.mxu2 }
 0x1c8   :  { %651 = dma.done.wait [#allocation4], 128  }
 0x1c9   :  { %652 = vsyncadd [#allocation4], 4294967168 }
 0x1ca   :  { %653 = dma.done.wait [#allocation12], 128  }
 0x1cb   :  { %654 = vsyncadd [#allocation12], 4294967168 }
 0x1cc   :  { %368 = vsyncpa [#allocation3], 1 }
 0x1cd   :  { %369 = vsyncpa [#allocation6], 1 }
 0x1ce   :  { %370 = vsyncpa [#allocation9], 1 }
 0x1cf   :  { %371 = vsyncpa [#allocation4], 1 }
 0x1d0   :  { %372 = vsyncpa [#allocation12], 1 }

</bundles_post_ra>
